<compile_context>
chip_gen: v5e
topology: v5e:2x2
jax: 0.10.0
libtpu: 0.0.40
codegen_flags: <defaults>
</compile_context>

<pallas_src>
import functools
import math
import random

import jax
import jax.numpy as jnp
from jax.experimental import pallas as pl
from jax.experimental.pallas import tpu as pltpu

_LANE = 128
_RING = 8                  # max in-flight DMAs per grid slice
_MAX_UNROLLED_FRAMES = 512  # beyond this, plain jnp.take is used instead


def _gather_frames_dma_kernel(keep_ref, x_hbm, out_hbm, sem,
                              *, frames_per_step, ring):
    """out_hbm[i] <- x_hbm[keep_ref[i]], one HBM->HBM DMA per output frame.

    frames_per_step / ring are static Python ints, so the issue loop is fully
    unrolled and all slot arithmetic is compile-time; the only dynamic values
    are pl.program_id(0) and the SMEM-resident keep indices.
    """
    pid = pl.program_id(0)
    base = pid * frames_per_step

    def _wait_slot(slot):
        # Only the transfer size (frame shape) and the semaphore matter for a
        # wait, so use static index 0 as a shape dummy: no re-read of keep_ref
        # after a wait.
        pltpu.make_async_copy(
            x_hbm.at[0], out_hbm.at[0], sem.at[pid, slot]
        ).wait()

    # Sliding window: start copy `step`, draining whichever copy used the same
    # semaphore slot `ring` steps earlier.
    for step in range(frames_per_step):
        slot = step % ring
        if step >= ring:
            _wait_slot(slot)
        dst = base + step
        pltpu.make_async_copy(
            x_hbm.at[keep_ref[dst]], out_hbm.at[dst], sem.at[pid, slot]
        ).start()

    # Drain the tail: the last min(ring, frames_per_step) outstanding copies.
    outstanding = min(ring, frames_per_step)
    for step in range(frames_per_step - outstanding, frames_per_step):
        _wait_slot(step % ring)


def _frame_gather(x_fr, keep_idx, *, num_slices):
    """x_fr: [T, ...frame...]; keep_idx: [T] int32.  Returns x_fr[keep_idx]."""
    T = x_fr.shape[0]
    grid = num_slices if (num_slices > 1 and T % num_slices == 0) else 1
    frames_per_step = T // grid
    ring = min(_RING, frames_per_step)
    nbytes = x_fr.size * x_fr.dtype.itemsize
    kernel = functools.partial(
        _gather_frames_dma_kernel, frames_per_step=frames_per_step, ring=ring
    )
    return pl.pallas_call(
        kernel,
        out_shape=jax.ShapeDtypeStruct(x_fr.shape, x_fr.dtype),
        grid_spec=pltpu.PrefetchScalarGridSpec(
            num_scalar_prefetch=1,                  # keep_idx -> SMEM
            grid=(grid,),
            in_specs=[pl.BlockSpec(memory_space=pl.ANY)],   # x stays in HBM
            out_specs=pl.BlockSpec(memory_space=pl.ANY),    # out stays in HBM
            scratch_shapes=[pltpu.SemaphoreType.DMA((grid, ring))],
        ),
        compiler_params=pltpu.CompilerParams(
            dimension_semantics=("parallel",)
        ),
        cost_estimate=pl.CostEstimate(
            flops=0, transcendentals=0, bytes_accessed=2 * nbytes
        ),
    )(keep_idx, x_fr)


def _device_kind():
    try:
        return jax.devices()[0].device_kind.lower()
    except Exception:
        return ""


def _num_tensorcores():
    # 2 TensorCores per chip only on v7x; v5e/v6e are single-TC.
    return 2 if "v7" in _device_kind() else 1


def _default_min_bytes_for_kernel():
    # On v7x (~3.2 TB/s) small copies are dispatch-bound -> raise the threshold.
    return (8 << 20) if "v7" in _device_kind() else (1 << 20)


def random_drop_frames(x, *, max_drop=2, p=0.5, rng=None,
                       min_bytes_for_kernel=None):
    """JAX/Pallas equivalent of RandomDropFrames.forward.  x: [T, C, H, W]."""
    if rng is None:
        rng = random.Random(0)

    T = x.shape[0]
    if T <= 1:
        return x

    # TODO(synk): host-side random.Random control flow mirrors the PyTorch
    # module; it is not traceable/jittable by construction.
    if rng.random() >= p:
        return x  # identity branch, no kernel needed

    drop_count = rng.randint(1, min(max_drop, T - 1))
    drop_indices = set(rng.sample(range(T), drop_count))
    keep_indices = [i for i in range(T) if i not in drop_indices]
    while len(keep_indices) < T:
        keep_indices.append(keep_indices[-1])
    keep_idx = jnp.asarray(keep_indices, dtype=jnp.int32)

    if min_bytes_for_kernel is None:
        min_bytes_for_kernel = _default_min_bytes_for_kernel()
    # Tiny inputs (dispatch-bound) or extremely long clips (unrolled issue
    # loop would bloat code) take the plain-XLA gather path.
    if (x.size * x.dtype.itemsize < min_bytes_for_kernel
            or T > _MAX_UNROLLED_FRAMES):
        return jnp.take(x, keep_idx, axis=0)

    # One-time flatten only -- no jnp.pad / post-slice passes.  When the flat
    # frame size is lane-aligned each frame is a contiguous tile run in HBM;
    # otherwise use a [T, D] view (strided per-frame DMA, still correct).
    frame_shape = x.shape[1:]
    D = math.prod(frame_shape)
    if D % _LANE == 0:
        x_fr = x.reshape(T, D // _LANE, _LANE)
    else:
        x_fr = x.reshape(T, D)

    out_fr = _frame_gather(x_fr, keep_idx, num_slices=_num_tensorcores())
    return out_fr.reshape(x.shape)


if __name__ == "__main__":
    # deterministic example input: T=8 frames, C=4, H=W=16 (frames-first)
    key = jax.random.PRNGKey(0)
    T, C, H, W = 8, 4, 16, 16
    x = jax.random.normal(key, (T, C, H, W), dtype=jnp.float32)

    # p=1.0 so the frame-drop (kernel) branch runs; min_bytes_for_kernel=0 so
    # the demo exercises the Pallas kernel rather than the small-input bypass.
    rng = random.Random(0)
    out = random_drop_frames(x, max_drop=2, p=1.0, rng=rng,
                             min_bytes_for_kernel=0)
    out = jax.block_until_ready(out)

    # reference check against plain-JAX gather using the same host RNG stream
    rng_ref = random.Random(0)
    _ = rng_ref.random()
    drop_count = rng_ref.randint(1, min(2, T - 1))
    drop_indices = set(rng_ref.sample(range(T), drop_count))
    keep = [i for i in range(T) if i not in drop_indices]
    while len(keep) < T:
        keep.append(keep[-1])
    ref = x[jnp.asarray(keep)]

    assert out.shape == x.shape and out.dtype == x.dtype
    assert bool(jnp.array_equal(out, ref))
    print("KERNEL_OK")
</pallas_src>

<mosaic_0001>
module attributes {stable_mosaic.version = 11 : i64} {
  func.func @_gather_frames_dma_kernel(%arg0: i32, %arg1: memref<8xi32, #tpu.memory_space<smem>>, %arg2: memref<8x8x128xf32, #tpu.memory_space<any>>, %arg3: memref<8x8x128xf32, #tpu.memory_space<any>>, %arg4: memref<1x8x!tpu.dma_semaphore, #tpu.memory_space<semaphore_mem>>) attributes {dimension_semantics = [#tpu.dimension_semantics<parallel>], iteration_bounds = array<i64: 1>, scalar_prefetch = 1 : i64, scratch_operands = 1 : i64, tpu.core_type = #tpu.core_type<tc>, window_params = [{}, {}]} {
    %c8_i32 = arith.constant 8 : i32
    %0 = arith.muli %arg0, %c8_i32 : i32
    %c0_i32 = arith.constant 0 : i32
    %1 = arith.addi %0, %c0_i32 : i32
    %2 = arith.index_cast %1 : i32 to index
    %3 = memref.load %arg1[%2] : memref<8xi32, #tpu.memory_space<smem>>
    %c0_i32_0 = arith.constant 0 : i32
    %c0_i32_1 = arith.constant 0 : i32
    %c0_i32_2 = arith.constant 0 : i32
    %4 = tpu.memref_slice %arg2[%3, %c0_i32_1, %c0_i32_2] : memref<8x8x128xf32, #tpu.memory_space<any>> -> memref<1x8x128xf32, #tpu.memory_space<any>>
    %5 = tpu.memref_squeeze %4 : memref<1x8x128xf32, #tpu.memory_space<any>> -> memref<8x128xf32, #tpu.memory_space<any>>
    %c0_i32_3 = arith.constant 0 : i32
    %c0_i32_4 = arith.constant 0 : i32
    %6 = tpu.memref_slice %arg3[%1, %c0_i32_3, %c0_i32_4] : memref<8x8x128xf32, #tpu.memory_space<any>> -> memref<1x8x128xf32, #tpu.memory_space<any>>
    %7 = tpu.memref_squeeze %6 : memref<1x8x128xf32, #tpu.memory_space<any>> -> memref<8x128xf32, #tpu.memory_space<any>>
    %8 = tpu.memref_slice %arg4[%arg0, %c0_i32_0] : memref<1x8x!tpu.dma_semaphore, #tpu.memory_space<semaphore_mem>> -> memref<1x1x!tpu.dma_semaphore, #tpu.memory_space<semaphore_mem>>
    %9 = tpu.memref_squeeze %8 : memref<1x1x!tpu.dma_semaphore, #tpu.memory_space<semaphore_mem>> -> memref<!tpu.dma_semaphore, #tpu.memory_space<semaphore_mem>>
    tpu.enqueue_dma source(%5 : memref<8x128xf32, #tpu.memory_space<any>>) target(%7 : memref<8x128xf32, #tpu.memory_space<any>>) target_semaphore(%9 : memref<!tpu.dma_semaphore, #tpu.memory_space<semaphore_mem>>)
    %c1_i32 = arith.constant 1 : i32
    %10 = arith.addi %0, %c1_i32 : i32
    %11 = arith.index_cast %10 : i32 to index
    %12 = memref.load %arg1[%11] : memref<8xi32, #tpu.memory_space<smem>>
    %c1_i32_5 = arith.constant 1 : i32
    %c0_i32_6 = arith.constant 0 : i32
    %c0_i32_7 = arith.constant 0 : i32
    %13 = tpu.memref_slice %arg2[%12, %c0_i32_6, %c0_i32_7] : memref<8x8x128xf32, #tpu.memory_space<any>> -> memref<1x8x128xf32, #tpu.memory_space<any>>
    %14 = tpu.memref_squeeze %13 : memref<1x8x128xf32, #tpu.memory_space<any>> -> memref<8x128xf32, #tpu.memory_space<any>>
    %c0_i32_8 = arith.constant 0 : i32
    %c0_i32_9 = arith.constant 0 : i32
    %15 = tpu.memref_slice %arg3[%10, %c0_i32_8, %c0_i32_9] : memref<8x8x128xf32, #tpu.memory_space<any>> -> memref<1x8x128xf32, #tpu.memory_space<any>>
    %16 = tpu.memref_squeeze %15 : memref<1x8x128xf32, #tpu.memory_space<any>> -> memref<8x128xf32, #tpu.memory_space<any>>
    %17 = tpu.memref_slice %arg4[%arg0, %c1_i32_5] : memref<1x8x!tpu.dma_semaphore, #tpu.memory_space<semaphore_mem>> -> memref<1x1x!tpu.dma_semaphore, #tpu.memory_space<semaphore_mem>>
    %18 = tpu.memref_squeeze %17 : memref<1x1x!tpu.dma_semaphore, #tpu.memory_space<semaphore_mem>> -> memref<!tpu.dma_semaphore, #tpu.memory_space<semaphore_mem>>
    tpu.enqueue_dma source(%14 : memref<8x128xf32, #tpu.memory_space<any>>) target(%16 : memref<8x128xf32, #tpu.memory_space<any>>) target_semaphore(%18 : memref<!tpu.dma_semaphore, #tpu.memory_space<semaphore_mem>>)
    %c2_i32 = arith.constant 2 : i32
    %19 = arith.addi %0, %c2_i32 : i32
    %20 = arith.index_cast %19 : i32 to index
    %21 = memref.load %arg1[%20] : memref<8xi32, #tpu.memory_space<smem>>
    %c2_i32_10 = arith.constant 2 : i32
    %c0_i32_11 = arith.constant 0 : i32
    %c0_i32_12 = arith.constant 0 : i32
    %22 = tpu.memref_slice %arg2[%21, %c0_i32_11, %c0_i32_12] : memref<8x8x128xf32, #tpu.memory_space<any>> -> memref<1x8x128xf32, #tpu.memory_space<any>>
    %23 = tpu.memref_squeeze %22 : memref<1x8x128xf32, #tpu.memory_space<any>> -> memref<8x128xf32, #tpu.memory_space<any>>
    %c0_i32_13 = arith.constant 0 : i32
    %c0_i32_14 = arith.constant 0 : i32
    %24 = tpu.memref_slice %arg3[%19, %c0_i32_13, %c0_i32_14] : memref<8x8x128xf32, #tpu.memory_space<any>> -> memref<1x8x128xf32, #tpu.memory_space<any>>
    %25 = tpu.memref_squeeze %24 : memref<1x8x128xf32, #tpu.memory_space<any>> -> memref<8x128xf32, #tpu.memory_space<any>>
    %26 = tpu.memref_slice %arg4[%arg0, %c2_i32_10] : memref<1x8x!tpu.dma_semaphore, #tpu.memory_space<semaphore_mem>> -> memref<1x1x!tpu.dma_semaphore, #tpu.memory_space<semaphore_mem>>
    %27 = tpu.memref_squeeze %26 : memref<1x1x!tpu.dma_semaphore, #tpu.memory_space<semaphore_mem>> -> memref<!tpu.dma_semaphore, #tpu.memory_space<semaphore_mem>>
    tpu.enqueue_dma source(%23 : memref<8x128xf32, #tpu.memory_space<any>>) target(%25 : memref<8x128xf32, #tpu.memory_space<any>>) target_semaphore(%27 : memref<!tpu.dma_semaphore, #tpu.memory_space<semaphore_mem>>)
    %c3_i32 = arith.constant 3 : i32
    %28 = arith.addi %0, %c3_i32 : i32
    %29 = arith.index_cast %28 : i32 to index
    %30 = memref.load %arg1[%29] : memref<8xi32, #tpu.memory_space<smem>>
    %c3_i32_15 = arith.constant 3 : i32
    %c0_i32_16 = arith.constant 0 : i32
    %c0_i32_17 = arith.constant 0 : i32
    %31 = tpu.memref_slice %arg2[%30, %c0_i32_16, %c0_i32_17] : memref<8x8x128xf32, #tpu.memory_space<any>> -> memref<1x8x128xf32, #tpu.memory_space<any>>
    %32 = tpu.memref_squeeze %31 : memref<1x8x128xf32, #tpu.memory_space<any>> -> memref<8x128xf32, #tpu.memory_space<any>>
    %c0_i32_18 = arith.constant 0 : i32
    %c0_i32_19 = arith.constant 0 : i32
    %33 = tpu.memref_slice %arg3[%28, %c0_i32_18, %c0_i32_19] : memref<8x8x128xf32, #tpu.memory_space<any>> -> memref<1x8x128xf32, #tpu.memory_space<any>>
    %34 = tpu.memref_squeeze %33 : memref<1x8x128xf32, #tpu.memory_space<any>> -> memref<8x128xf32, #tpu.memory_space<any>>
    %35 = tpu.memref_slice %arg4[%arg0, %c3_i32_15] : memref<1x8x!tpu.dma_semaphore, #tpu.memory_space<semaphore_mem>> -> memref<1x1x!tpu.dma_semaphore, #tpu.memory_space<semaphore_mem>>
    %36 = tpu.memref_squeeze %35 : memref<1x1x!tpu.dma_semaphore, #tpu.memory_space<semaphore_mem>> -> memref<!tpu.dma_semaphore, #tpu.memory_space<semaphore_mem>>
    tpu.enqueue_dma source(%32 : memref<8x128xf32, #tpu.memory_space<any>>) target(%34 : memref<8x128xf32, #tpu.memory_space<any>>) target_semaphore(%36 : memref<!tpu.dma_semaphore, #tpu.memory_space<semaphore_mem>>)
    %c4_i32 = arith.constant 4 : i32
    %37 = arith.addi %0, %c4_i32 : i32
    %38 = arith.index_cast %37 : i32 to index
    %39 = memref.load %arg1[%38] : memref<8xi32, #tpu.memory_space<smem>>
    %c4_i32_20 = arith.constant 4 : i32
    %c0_i32_21 = arith.constant 0 : i32
    %c0_i32_22 = arith.constant 0 : i32
    %40 = tpu.memref_slice %arg2[%39, %c0_i32_21, %c0_i32_22] : memref<8x8x128xf32, #tpu.memory_space<any>> -> memref<1x8x128xf32, #tpu.memory_space<any>>
    %41 = tpu.memref_squeeze %40 : memref<1x8x128xf32, #tpu.memory_space<any>> -> memref<8x128xf32, #tpu.memory_space<any>>
    %c0_i32_23 = arith.constant 0 : i32
    %c0_i32_24 = arith.constant 0 : i32
    %42 = tpu.memref_slice %arg3[%37, %c0_i32_23, %c0_i32_24] : memref<8x8x128xf32, #tpu.memory_space<any>> -> memref<1x8x128xf32, #tpu.memory_space<any>>
    %43 = tpu.memref_squeeze %42 : memref<1x8x128xf32, #tpu.memory_space<any>> -> memref<8x128xf32, #tpu.memory_space<any>>
    %44 = tpu.memref_slice %arg4[%arg0, %c4_i32_20] : memref<1x8x!tpu.dma_semaphore, #tpu.memory_space<semaphore_mem>> -> memref<1x1x!tpu.dma_semaphore, #tpu.memory_space<semaphore_mem>>
    %45 = tpu.memref_squeeze %44 : memref<1x1x!tpu.dma_semaphore, #tpu.memory_space<semaphore_mem>> -> memref<!tpu.dma_semaphore, #tpu.memory_space<semaphore_mem>>
    tpu.enqueue_dma source(%41 : memref<8x128xf32, #tpu.memory_space<any>>) target(%43 : memref<8x128xf32, #tpu.memory_space<any>>) target_semaphore(%45 : memref<!tpu.dma_semaphore, #tpu.memory_space<semaphore_mem>>)
    %c5_i32 = arith.constant 5 : i32
    %46 = arith.addi %0, %c5_i32 : i32
    %47 = arith.index_cast %46 : i32 to index
    %48 = memref.load %arg1[%47] : memref<8xi32, #tpu.memory_space<smem>>
    %c5_i32_25 = arith.constant 5 : i32
    %c0_i32_26 = arith.constant 0 : i32
    %c0_i32_27 = arith.constant 0 : i32
    %49 = tpu.memref_slice %arg2[%48, %c0_i32_26, %c0_i32_27] : memref<8x8x128xf32, #tpu.memory_space<any>> -> memref<1x8x128xf32, #tpu.memory_space<any>>
    %50 = tpu.memref_squeeze %49 : memref<1x8x128xf32, #tpu.memory_space<any>> -> memref<8x128xf32, #tpu.memory_space<any>>
    %c0_i32_28 = arith.constant 0 : i32
    %c0_i32_29 = arith.constant 0 : i32
    %51 = tpu.memref_slice %arg3[%46, %c0_i32_28, %c0_i32_29] : memref<8x8x128xf32, #tpu.memory_space<any>> -> memref<1x8x128xf32, #tpu.memory_space<any>>
    %52 = tpu.memref_squeeze %51 : memref<1x8x128xf32, #tpu.memory_space<any>> -> memref<8x128xf32, #tpu.memory_space<any>>
    %53 = tpu.memref_slice %arg4[%arg0, %c5_i32_25] : memref<1x8x!tpu.dma_semaphore, #tpu.memory_space<semaphore_mem>> -> memref<1x1x!tpu.dma_semaphore, #tpu.memory_space<semaphore_mem>>
    %54 = tpu.memref_squeeze %53 : memref<1x1x!tpu.dma_semaphore, #tpu.memory_space<semaphore_mem>> -> memref<!tpu.dma_semaphore, #tpu.memory_space<semaphore_mem>>
    tpu.enqueue_dma source(%50 : memref<8x128xf32, #tpu.memory_space<any>>) target(%52 : memref<8x128xf32, #tpu.memory_space<any>>) target_semaphore(%54 : memref<!tpu.dma_semaphore, #tpu.memory_space<semaphore_mem>>)
    %c6_i32 = arith.constant 6 : i32
    %55 = arith.addi %0, %c6_i32 : i32
    %56 = arith.index_cast %55 : i32 to index
    %57 = memref.load %arg1[%56] : memref<8xi32, #tpu.memory_space<smem>>
    %c6_i32_30 = arith.constant 6 : i32
    %c0_i32_31 = arith.constant 0 : i32
    %c0_i32_32 = arith.constant 0 : i32
    %58 = tpu.memref_slice %arg2[%57, %c0_i32_31, %c0_i32_32] : memref<8x8x128xf32, #tpu.memory_space<any>> -> memref<1x8x128xf32, #tpu.memory_space<any>>
    %59 = tpu.memref_squeeze %58 : memref<1x8x128xf32, #tpu.memory_space<any>> -> memref<8x128xf32, #tpu.memory_space<any>>
    %c0_i32_33 = arith.constant 0 : i32
    %c0_i32_34 = arith.constant 0 : i32
    %60 = tpu.memref_slice %arg3[%55, %c0_i32_33, %c0_i32_34] : memref<8x8x128xf32, #tpu.memory_space<any>> -> memref<1x8x128xf32, #tpu.memory_space<any>>
    %61 = tpu.memref_squeeze %60 : memref<1x8x128xf32, #tpu.memory_space<any>> -> memref<8x128xf32, #tpu.memory_space<any>>
    %62 = tpu.memref_slice %arg4[%arg0, %c6_i32_30] : memref<1x8x!tpu.dma_semaphore, #tpu.memory_space<semaphore_mem>> -> memref<1x1x!tpu.dma_semaphore, #tpu.memory_space<semaphore_mem>>
    %63 = tpu.memref_squeeze %62 : memref<1x1x!tpu.dma_semaphore, #tpu.memory_space<semaphore_mem>> -> memref<!tpu.dma_semaphore, #tpu.memory_space<semaphore_mem>>
    tpu.enqueue_dma source(%59 : memref<8x128xf32, #tpu.memory_space<any>>) target(%61 : memref<8x128xf32, #tpu.memory_space<any>>) target_semaphore(%63 : memref<!tpu.dma_semaphore, #tpu.memory_space<semaphore_mem>>)
    %c7_i32 = arith.constant 7 : i32
    %64 = arith.addi %0, %c7_i32 : i32
    %65 = arith.index_cast %64 : i32 to index
    %66 = memref.load %arg1[%65] : memref<8xi32, #tpu.memory_space<smem>>
    %c7_i32_35 = arith.constant 7 : i32
    %c0_i32_36 = arith.constant 0 : i32
    %c0_i32_37 = arith.constant 0 : i32
    %67 = tpu.memref_slice %arg2[%66, %c0_i32_36, %c0_i32_37] : memref<8x8x128xf32, #tpu.memory_space<any>> -> memref<1x8x128xf32, #tpu.memory_space<any>>
    %68 = tpu.memref_squeeze %67 : memref<1x8x128xf32, #tpu.memory_space<any>> -> memref<8x128xf32, #tpu.memory_space<any>>
    %c0_i32_38 = arith.constant 0 : i32
    %c0_i32_39 = arith.constant 0 : i32
    %69 = tpu.memref_slice %arg3[%64, %c0_i32_38, %c0_i32_39] : memref<8x8x128xf32, #tpu.memory_space<any>> -> memref<1x8x128xf32, #tpu.memory_space<any>>
    %70 = tpu.memref_squeeze %69 : memref<1x8x128xf32, #tpu.memory_space<any>> -> memref<8x128xf32, #tpu.memory_space<any>>
    %71 = tpu.memref_slice %arg4[%arg0, %c7_i32_35] : memref<1x8x!tpu.dma_semaphore, #tpu.memory_space<semaphore_mem>> -> memref<1x1x!tpu.dma_semaphore, #tpu.memory_space<semaphore_mem>>
    %72 = tpu.memref_squeeze %71 : memref<1x1x!tpu.dma_semaphore, #tpu.memory_space<semaphore_mem>> -> memref<!tpu.dma_semaphore, #tpu.memory_space<semaphore_mem>>
    tpu.enqueue_dma source(%68 : memref<8x128xf32, #tpu.memory_space<any>>) target(%70 : memref<8x128xf32, #tpu.memory_space<any>>) target_semaphore(%72 : memref<!tpu.dma_semaphore, #tpu.memory_space<semaphore_mem>>)
    %c0_i32_40 = arith.constant 0 : i32
    %c0_i32_41 = arith.constant 0 : i32
    %c0_i32_42 = arith.constant 0 : i32
    %c0_i32_43 = arith.constant 0 : i32
    %c0_i32_44 = arith.constant 0 : i32
    %73 = tpu.memref_slice %arg2[%c0_i32_40, %c0_i32_43, %c0_i32_44] : memref<8x8x128xf32, #tpu.memory_space<any>> -> memref<1x8x128xf32, #tpu.memory_space<any>>
    %74 = tpu.memref_squeeze %73 : memref<1x8x128xf32, #tpu.memory_space<any>> -> memref<8x128xf32, #tpu.memory_space<any>>
    %c0_i32_45 = arith.constant 0 : i32
    %c0_i32_46 = arith.constant 0 : i32
    %75 = tpu.memref_slice %arg3[%c0_i32_41, %c0_i32_45, %c0_i32_46] : memref<8x8x128xf32, #tpu.memory_space<any>> -> memref<1x8x128xf32, #tpu.memory_space<any>>
    %76 = tpu.memref_squeeze %75 : memref<1x8x128xf32, #tpu.memory_space<any>> -> memref<8x128xf32, #tpu.memory_space<any>>
    %77 = tpu.memref_slice %arg4[%arg0, %c0_i32_42] : memref<1x8x!tpu.dma_semaphore, #tpu.memory_space<semaphore_mem>> -> memref<1x1x!tpu.dma_semaphore, #tpu.memory_space<semaphore_mem>>
    %78 = tpu.memref_squeeze %77 : memref<1x1x!tpu.dma_semaphore, #tpu.memory_space<semaphore_mem>> -> memref<!tpu.dma_semaphore, #tpu.memory_space<semaphore_mem>>
    tpu.wait_dma2 semaphore(%78 : memref<!tpu.dma_semaphore, #tpu.memory_space<semaphore_mem>>) src(%74 : memref<8x128xf32, #tpu.memory_space<any>>) dst(%76 : memref<8x128xf32, #tpu.memory_space<any>>)
    %c0_i32_47 = arith.constant 0 : i32
    %c0_i32_48 = arith.constant 0 : i32
    %c1_i32_49 = arith.constant 1 : i32
    %c0_i32_50 = arith.constant 0 : i32
    %c0_i32_51 = arith.constant 0 : i32
    %79 = tpu.memref_slice %arg2[%c0_i32_47, %c0_i32_50, %c0_i32_51] : memref<8x8x128xf32, #tpu.memory_space<any>> -> memref<1x8x128xf32, #tpu.memory_space<any>>
    %80 = tpu.memref_squeeze %79 : memref<1x8x128xf32, #tpu.memory_space<any>> -> memref<8x128xf32, #tpu.memory_space<any>>
    %c0_i32_52 = arith.constant 0 : i32
    %c0_i32_53 = arith.constant 0 : i32
    %81 = tpu.memref_slice %arg3[%c0_i32_48, %c0_i32_52, %c0_i32_53] : memref<8x8x128xf32, #tpu.memory_space<any>> -> memref<1x8x128xf32, #tpu.memory_space<any>>
    %82 = tpu.memref_squeeze %81 : memref<1x8x128xf32, #tpu.memory_space<any>> -> memref<8x128xf32, #tpu.memory_space<any>>
    %83 = tpu.memref_slice %arg4[%arg0, %c1_i32_49] : memref<1x8x!tpu.dma_semaphore, #tpu.memory_space<semaphore_mem>> -> memref<1x1x!tpu.dma_semaphore, #tpu.memory_space<semaphore_mem>>
    %84 = tpu.memref_squeeze %83 : memref<1x1x!tpu.dma_semaphore, #tpu.memory_space<semaphore_mem>> -> memref<!tpu.dma_semaphore, #tpu.memory_space<semaphore_mem>>
    tpu.wait_dma2 semaphore(%84 : memref<!tpu.dma_semaphore, #tpu.memory_space<semaphore_mem>>) src(%80 : memref<8x128xf32, #tpu.memory_space<any>>) dst(%82 : memref<8x128xf32, #tpu.memory_space<any>>)
    %c0_i32_54 = arith.constant 0 : i32
    %c0_i32_55 = arith.constant 0 : i32
    %c2_i32_56 = arith.constant 2 : i32
    %c0_i32_57 = arith.constant 0 : i32
    %c0_i32_58 = arith.constant 0 : i32
    %85 = tpu.memref_slice %arg2[%c0_i32_54, %c0_i32_57, %c0_i32_58] : memref<8x8x128xf32, #tpu.memory_space<any>> -> memref<1x8x128xf32, #tpu.memory_space<any>>
    %86 = tpu.memref_squeeze %85 : memref<1x8x128xf32, #tpu.memory_space<any>> -> memref<8x128xf32, #tpu.memory_space<any>>
    %c0_i32_59 = arith.constant 0 : i32
    %c0_i32_60 = arith.constant 0 : i32
    %87 = tpu.memref_slice %arg3[%c0_i32_55, %c0_i32_59, %c0_i32_60] : memref<8x8x128xf32, #tpu.memory_space<any>> -> memref<1x8x128xf32, #tpu.memory_space<any>>
    %88 = tpu.memref_squeeze %87 : memref<1x8x128xf32, #tpu.memory_space<any>> -> memref<8x128xf32, #tpu.memory_space<any>>
    %89 = tpu.memref_slice %arg4[%arg0, %c2_i32_56] : memref<1x8x!tpu.dma_semaphore, #tpu.memory_space<semaphore_mem>> -> memref<1x1x!tpu.dma_semaphore, #tpu.memory_space<semaphore_mem>>
    %90 = tpu.memref_squeeze %89 : memref<1x1x!tpu.dma_semaphore, #tpu.memory_space<semaphore_mem>> -> memref<!tpu.dma_semaphore, #tpu.memory_space<semaphore_mem>>
    tpu.wait_dma2 semaphore(%90 : memref<!tpu.dma_semaphore, #tpu.memory_space<semaphore_mem>>) src(%86 : memref<8x128xf32, #tpu.memory_space<any>>) dst(%88 : memref<8x128xf32, #tpu.memory_space<any>>)
    %c0_i32_61 = arith.constant 0 : i32
    %c0_i32_62 = arith.constant 0 : i32
    %c3_i32_63 = arith.constant 3 : i32
    %c0_i32_64 = arith.constant 0 : i32
    %c0_i32_65 = arith.constant 0 : i32
    %91 = tpu.memref_slice %arg2[%c0_i32_61, %c0_i32_64, %c0_i32_65] : memref<8x8x128xf32, #tpu.memory_space<any>> -> memref<1x8x128xf32, #tpu.memory_space<any>>
    %92 = tpu.memref_squeeze %91 : memref<1x8x128xf32, #tpu.memory_space<any>> -> memref<8x128xf32, #tpu.memory_space<any>>
    %c0_i32_66 = arith.constant 0 : i32
    %c0_i32_67 = arith.constant 0 : i32
    %93 = tpu.memref_slice %arg3[%c0_i32_62, %c0_i32_66, %c0_i32_67] : memref<8x8x128xf32, #tpu.memory_space<any>> -> memref<1x8x128xf32, #tpu.memory_space<any>>
    %94 = tpu.memref_squeeze %93 : memref<1x8x128xf32, #tpu.memory_space<any>> -> memref<8x128xf32, #tpu.memory_space<any>>
    %95 = tpu.memref_slice %arg4[%arg0, %c3_i32_63] : memref<1x8x!tpu.dma_semaphore, #tpu.memory_space<semaphore_mem>> -> memref<1x1x!tpu.dma_semaphore, #tpu.memory_space<semaphore_mem>>
    %96 = tpu.memref_squeeze %95 : memref<1x1x!tpu.dma_semaphore, #tpu.memory_space<semaphore_mem>> -> memref<!tpu.dma_semaphore, #tpu.memory_space<semaphore_mem>>
    tpu.wait_dma2 semaphore(%96 : memref<!tpu.dma_semaphore, #tpu.memory_space<semaphore_mem>>) src(%92 : memref<8x128xf32, #tpu.memory_space<any>>) dst(%94 : memref<8x128xf32, #tpu.memory_space<any>>)
    %c0_i32_68 = arith.constant 0 : i32
    %c0_i32_69 = arith.constant 0 : i32
    %c4_i32_70 = arith.constant 4 : i32
    %c0_i32_71 = arith.constant 0 : i32
    %c0_i32_72 = arith.constant 0 : i32
    %97 = tpu.memref_slice %arg2[%c0_i32_68, %c0_i32_71, %c0_i32_72] : memref<8x8x128xf32, #tpu.memory_space<any>> -> memref<1x8x128xf32, #tpu.memory_space<any>>
    %98 = tpu.memref_squeeze %97 : memref<1x8x128xf32, #tpu.memory_space<any>> -> memref<8x128xf32, #tpu.memory_space<any>>
    %c0_i32_73 = arith.constant 0 : i32
    %c0_i32_74 = arith.constant 0 : i32
    %99 = tpu.memref_slice %arg3[%c0_i32_69, %c0_i32_73, %c0_i32_74] : memref<8x8x128xf32, #tpu.memory_space<any>> -> memref<1x8x128xf32, #tpu.memory_space<any>>
    %100 = tpu.memref_squeeze %99 : memref<1x8x128xf32, #tpu.memory_space<any>> -> memref<8x128xf32, #tpu.memory_space<any>>
    %101 = tpu.memref_slice %arg4[%arg0, %c4_i32_70] : memref<1x8x!tpu.dma_semaphore, #tpu.memory_space<semaphore_mem>> -> memref<1x1x!tpu.dma_semaphore, #tpu.memory_space<semaphore_mem>>
    %102 = tpu.memref_squeeze %101 : memref<1x1x!tpu.dma_semaphore, #tpu.memory_space<semaphore_mem>> -> memref<!tpu.dma_semaphore, #tpu.memory_space<semaphore_mem>>
    tpu.wait_dma2 semaphore(%102 : memref<!tpu.dma_semaphore, #tpu.memory_space<semaphore_mem>>) src(%98 : memref<8x128xf32, #tpu.memory_space<any>>) dst(%100 : memref<8x128xf32, #tpu.memory_space<any>>)
    %c0_i32_75 = arith.constant 0 : i32
    %c0_i32_76 = arith.constant 0 : i32
    %c5_i32_77 = arith.constant 5 : i32
    %c0_i32_78 = arith.constant 0 : i32
    %c0_i32_79 = arith.constant 0 : i32
    %103 = tpu.memref_slice %arg2[%c0_i32_75, %c0_i32_78, %c0_i32_79] : memref<8x8x128xf32, #tpu.memory_space<any>> -> memref<1x8x128xf32, #tpu.memory_space<any>>
    %104 = tpu.memref_squeeze %103 : memref<1x8x128xf32, #tpu.memory_space<any>> -> memref<8x128xf32, #tpu.memory_space<any>>
    %c0_i32_80 = arith.constant 0 : i32
    %c0_i32_81 = arith.constant 0 : i32
    %105 = tpu.memref_slice %arg3[%c0_i32_76, %c0_i32_80, %c0_i32_81] : memref<8x8x128xf32, #tpu.memory_space<any>> -> memref<1x8x128xf32, #tpu.memory_space<any>>
    %106 = tpu.memref_squeeze %105 : memref<1x8x128xf32, #tpu.memory_space<any>> -> memref<8x128xf32, #tpu.memory_space<any>>
    %107 = tpu.memref_slice %arg4[%arg0, %c5_i32_77] : memref<1x8x!tpu.dma_semaphore, #tpu.memory_space<semaphore_mem>> -> memref<1x1x!tpu.dma_semaphore, #tpu.memory_space<semaphore_mem>>
    %108 = tpu.memref_squeeze %107 : memref<1x1x!tpu.dma_semaphore, #tpu.memory_space<semaphore_mem>> -> memref<!tpu.dma_semaphore, #tpu.memory_space<semaphore_mem>>
    tpu.wait_dma2 semaphore(%108 : memref<!tpu.dma_semaphore, #tpu.memory_space<semaphore_mem>>) src(%104 : memref<8x128xf32, #tpu.memory_space<any>>) dst(%106 : memref<8x128xf32, #tpu.memory_space<any>>)
    %c0_i32_82 = arith.constant 0 : i32
    %c0_i32_83 = arith.constant 0 : i32
    %c6_i32_84 = arith.constant 6 : i32
    %c0_i32_85 = arith.constant 0 : i32
    %c0_i32_86 = arith.constant 0 : i32
    %109 = tpu.memref_slice %arg2[%c0_i32_82, %c0_i32_85, %c0_i32_86] : memref<8x8x128xf32, #tpu.memory_space<any>> -> memref<1x8x128xf32, #tpu.memory_space<any>>
    %110 = tpu.memref_squeeze %109 : memref<1x8x128xf32, #tpu.memory_space<any>> -> memref<8x128xf32, #tpu.memory_space<any>>
    %c0_i32_87 = arith.constant 0 : i32
    %c0_i32_88 = arith.constant 0 : i32
    %111 = tpu.memref_slice %arg3[%c0_i32_83, %c0_i32_87, %c0_i32_88] : memref<8x8x128xf32, #tpu.memory_space<any>> -> memref<1x8x128xf32, #tpu.memory_space<any>>
    %112 = tpu.memref_squeeze %111 : memref<1x8x128xf32, #tpu.memory_space<any>> -> memref<8x128xf32, #tpu.memory_space<any>>
    %113 = tpu.memref_slice %arg4[%arg0, %c6_i32_84] : memref<1x8x!tpu.dma_semaphore, #tpu.memory_space<semaphore_mem>> -> memref<1x1x!tpu.dma_semaphore, #tpu.memory_space<semaphore_mem>>
    %114 = tpu.memref_squeeze %113 : memref<1x1x!tpu.dma_semaphore, #tpu.memory_space<semaphore_mem>> -> memref<!tpu.dma_semaphore, #tpu.memory_space<semaphore_mem>>
    tpu.wait_dma2 semaphore(%114 : memref<!tpu.dma_semaphore, #tpu.memory_space<semaphore_mem>>) src(%110 : memref<8x128xf32, #tpu.memory_space<any>>) dst(%112 : memref<8x128xf32, #tpu.memory_space<any>>)
    %c0_i32_89 = arith.constant 0 : i32
    %c0_i32_90 = arith.constant 0 : i32
    %c7_i32_91 = arith.constant 7 : i32
    %c0_i32_92 = arith.constant 0 : i32
    %c0_i32_93 = arith.constant 0 : i32
    %115 = tpu.memref_slice %arg2[%c0_i32_89, %c0_i32_92, %c0_i32_93] : memref<8x8x128xf32, #tpu.memory_space<any>> -> memref<1x8x128xf32, #tpu.memory_space<any>>
    %116 = tpu.memref_squeeze %115 : memref<1x8x128xf32, #tpu.memory_space<any>> -> memref<8x128xf32, #tpu.memory_space<any>>
    %c0_i32_94 = arith.constant 0 : i32
    %c0_i32_95 = arith.constant 0 : i32
    %117 = tpu.memref_slice %arg3[%c0_i32_90, %c0_i32_94, %c0_i32_95] : memref<8x8x128xf32, #tpu.memory_space<any>> -> memref<1x8x128xf32, #tpu.memory_space<any>>
    %118 = tpu.memref_squeeze %117 : memref<1x8x128xf32, #tpu.memory_space<any>> -> memref<8x128xf32, #tpu.memory_space<any>>
    %119 = tpu.memref_slice %arg4[%arg0, %c7_i32_91] : memref<1x8x!tpu.dma_semaphore, #tpu.memory_space<semaphore_mem>> -> memref<1x1x!tpu.dma_semaphore, #tpu.memory_space<semaphore_mem>>
    %120 = tpu.memref_squeeze %119 : memref<1x1x!tpu.dma_semaphore, #tpu.memory_space<semaphore_mem>> -> memref<!tpu.dma_semaphore, #tpu.memory_space<semaphore_mem>>
    tpu.wait_dma2 semaphore(%120 : memref<!tpu.dma_semaphore, #tpu.memory_space<semaphore_mem>>) src(%116 : memref<8x128xf32, #tpu.memory_space<any>>) dst(%118 : memref<8x128xf32, #tpu.memory_space<any>>)
    return
  }
}

</mosaic_0001>

<bundles_post_ra>
// kernel: tpu_custom_call.1
= control target key start
LH: loop header
LB: loop body
LE: loop exit
PB: predicated region body
PF: predicated region fallthrough
CT: control target
= control target key end

     0   :  { %s339_s12 = smov [#allocation4]   ;;  %s431_s0 = inlined_call_operand.hbm [shape: s32[8], index: 0, kind: input, shape index: {}]   ;;  %s432_s1 = inlined_call_operand.hbm [shape: f32[8,8,128], index: 1, kind: input, shape index: {}]   ;;  %s433_s2 = inlined_call_operand.hbm [shape: f32[8,8,128], index: 2, kind: output, shape index: {}]  }
   0x1   :  { %s8_s11 = sshll.u32 %s431_s0, 4  ;;  %s9_s11 = int_to_ptr.hbm [resolvable:$true] %s8_s11 }
   0x2   :  { %11 = dma.hbm_to_smem %s9_s11, 16, %s339_s12, [#allocation3] }
   0x3   :  { %321 = dma.done.wait [#allocation3], 16 }
   0x4   :  { %322 = vsyncadd [#allocation3], 4294967280 }
   0x5   :  { %14 = sfence }
   0x6   :  { %s16_s13 = sld [smem:[#allocation4]]  ;;  %s28_s16 = sshll.u32 %s433_s2, 4  ;;  %s29_s16 = int_to_ptr.hbm [resolvable:$true] %s28_s16 }
   0x7   :  { %s340_s0 = smov [#allocation2]   ;;  %s341_s22 = smov [#allocation5]  }
   0x8   :  { %s342_s23 = smov 0   ;;  %s242_s27 = scalar_lea.hbm %s433_s2, 8 }
   0x9   :  { %s47_s28 = sshll.u32 %s242_s27, 4  ;;  %s246_s8 = scalar_lea.hbm %s433_s2, 16  ;;  %s48_s28 = int_to_ptr.hbm [resolvable:$true] %s47_s28 }
   0xa   :  { %s343_s9 = smov [#allocation2 + $0x1]   ;;  %s344_s10 = smov [#allocation7]  }
   0xb   :  { %s66_s12 = sshll.u32 %s246_s8, 4  ;;  %s345_s18 = smov [#allocation2 + $0x2]   ;;  %s67_s12 = int_to_ptr.hbm [resolvable:$true] %s66_s12 }
   0xc   :  { %s268_s17 = sshll.u32 %s16_s13, 3  ;;  %s346_s19 = smov [#allocation9]  }
   0xd   :  { %s18_s20 = scalar_lea.hbm %s432_s1, %s268_s17  ;;  %s347_s30 = smov [#allocation2 + $0x3]  }
   0xe   :  { %s26_s21 = sshll.u32 %s18_s20, 4  ;;  %s348_s3 = smov [#allocation11]   ;;  %s27_s21 = int_to_ptr.hbm [resolvable:$true] %s26_s21 }
   0xf   :  { %32 = dma.general %s27_s21, 128, %s29_s16, %s340_s0, %s341_s22, [#allocation6], %s342_s23, 0  }
  0x10   :  { %s269_s24 = sld [smem:[#allocation4 + $0x1]]  ;;  %s250_s22 = scalar_lea.hbm %s433_s2, 24 }
  0x11   :  { %s254_s7 = scalar_lea.hbm %s433_s2, 32  ;;  %s351_s26 = smov [#allocation2 + $0x5]  }
  0x12   :  { %s104_s8 = sshll.u32 %s254_s7, 4  ;;  %s352_s27 = smov [#allocation15]   ;;  %s105_s8 = int_to_ptr.hbm [resolvable:$true] %s104_s8 }
  0x13   :  { %s266_s15 = scalar_lea.hbm %s433_s2, 56  ;;  %s355_s0 = smov [#allocation2 + $0x7]  }
  0x16   :  { %s270_s29 = sshll.u32 %s269_s24, 3  ;;  %s85_s24 = sshll.u32 %s250_s22, 4  ;;  %s86_s24 = int_to_ptr.hbm [resolvable:$true] %s85_s24 }
  0x17   :  { %s36_s4 = scalar_lea.hbm %s432_s1, %s270_s29  ;;  %s356_s22 = smov [#allocation19]  }
  0x18   :  { %s45_s5 = sshll.u32 %s36_s4, 4  ;;  %s46_s5 = int_to_ptr.hbm [resolvable:$true] %s45_s5 }
  0x19   :  { %51 = dma.general %s46_s5, 128, %s48_s28, %s343_s9, %s344_s10, [#allocation8], %s342_s23, 0  }
  0x1a   :  { %s271_s11 = sld [smem:[#allocation4 + $0x2]]  ;;  %s353_s10 = smov [#allocation2 + $0x6]  }
  0x20   :  { %s272_s13 = sshll.u32 %s271_s11, 3  ;;  %s354_s11 = smov [#allocation17]  }
  0x21   :  { %s55_s16 = scalar_lea.hbm %s432_s1, %s272_s13 }
  0x22   :  { %s64_s17 = sshll.u32 %s55_s16, 4  ;;  %s258_s16 = scalar_lea.hbm %s433_s2, 40  ;;  %s65_s17 = int_to_ptr.hbm [resolvable:$true] %s64_s17 }
  0x23   :  { %70 = dma.general %s65_s17, 128, %s67_s12, %s345_s18, %s346_s19, [#allocation10], %s342_s23, 0  }
  0x24   :  { %s273_s20 = sld [smem:[#allocation4 + $0x3]]  ;;  %s349_s17 = smov [#allocation2 + $0x4]  }
  0x25   :  { %s350_s18 = smov [#allocation13]  }
  0x2a   :  { %s274_s25 = sshll.u32 %s273_s20, 3  ;;  %s123_s20 = sshll.u32 %s258_s16, 4  ;;  %s124_s20 = int_to_ptr.hbm [resolvable:$true] %s123_s20 }
  0x2b   :  { %s74_s28 = scalar_lea.hbm %s432_s1, %s274_s25  ;;  %s161_s16 = sshll.u32 %s266_s15, 4  ;;  %s162_s16 = int_to_ptr.hbm [resolvable:$true] %s161_s16 }
  0x2c   :  { %s83_s29 = sshll.u32 %s74_s28, 4  ;;  %s84_s29 = int_to_ptr.hbm [resolvable:$true] %s83_s29 }
  0x2d   :  { %89 = dma.general %s84_s29, 128, %s86_s24, %s347_s30, %s348_s3, [#allocation12], %s342_s23, 0  }
  0x2e   :  { %s275_s4 = sld [smem:[#allocation4 + $0x4]]  ;;  %s262_s3 = scalar_lea.hbm %s433_s2, 48 }
  0x34   :  { %s276_s9 = sshll.u32 %s275_s4, 3  ;;  %s142_s4 = sshll.u32 %s262_s3, 4  ;;  %s143_s4 = int_to_ptr.hbm [resolvable:$true] %s142_s4 }
  0x35   :  { %s93_s12 = scalar_lea.hbm %s432_s1, %s276_s9 }
  0x36   :  { %s102_s13 = sshll.u32 %s93_s12, 4  ;;  %s103_s13 = int_to_ptr.hbm [resolvable:$true] %s102_s13 }
  0x37   :  { %108 = dma.general %s103_s13, 128, %s105_s8, %s349_s17, %s350_s18, [#allocation14], %s342_s23, 0  }
  0x38   :  { %s277_s19 = sld [smem:[#allocation4 + $0x5]] }
  0x3e   :  { %s278_s21 = sshll.u32 %s277_s19, 3 }
  0x3f   :  { %s112_s24 = scalar_lea.hbm %s432_s1, %s278_s21 }
  0x40   :  { %s121_s25 = sshll.u32 %s112_s24, 4  ;;  %s122_s25 = int_to_ptr.hbm [resolvable:$true] %s121_s25 }
  0x41   :  { %127 = dma.general %s122_s25, 128, %s124_s20, %s351_s26, %s352_s27, [#allocation16], %s342_s23, 0  }
  0x42   :  { %s279_s28 = sld [smem:[#allocation4 + $0x6]] }
  0x48   :  { %s280_s5 = sshll.u32 %s279_s28, 3 }
  0x49   :  { %s131_s8 = scalar_lea.hbm %s432_s1, %s280_s5 }
  0x4a   :  { %s140_s9 = sshll.u32 %s131_s8, 4  ;;  %s141_s9 = int_to_ptr.hbm [resolvable:$true] %s140_s9 }
  0x4b   :  { %146 = dma.general %s141_s9, 128, %s143_s4, %s353_s10, %s354_s11, [#allocation18], %s342_s23, 0  }
  0x4c   :  { %s281_s12 = sld [smem:[#allocation4 + $0x7]] }
  0x52   :  { %s282_s17 = sshll.u32 %s281_s12, 3 }
  0x53   :  { %s150_s20 = scalar_lea.hbm %s432_s1, %s282_s17 }
  0x54   :  { %s159_s21 = sshll.u32 %s150_s20, 4  ;;  %s160_s21 = int_to_ptr.hbm [resolvable:$true] %s159_s21 }
  0x55   :  { %165 = dma.general %s160_s21, 128, %s162_s16, %s355_s0, %s356_s22, [#allocation20], %s342_s23, 0  }
  0x56   :  { %323 = dma.done.wait [#allocation2], 128 }
  0x57   :  { %324 = vsyncadd [#allocation2], 4294967168 }
  0x58   :  { %325 = dma.done.wait [#allocation2 + $0x1], 128 }
  0x59   :  { %326 = vsyncadd [#allocation2 + $0x1], 4294967168 }
  0x5a   :  { %327 = dma.done.wait [#allocation2 + $0x2], 128 }
  0x5b   :  { %328 = vsyncadd [#allocation2 + $0x2], 4294967168 }
  0x5c   :  { %329 = dma.done.wait [#allocation2 + $0x3], 128 }
  0x5d   :  { %330 = vsyncadd [#allocation2 + $0x3], 4294967168 }
  0x5e   :  { %331 = dma.done.wait [#allocation2 + $0x4], 128 }
  0x5f   :  { %332 = vsyncadd [#allocation2 + $0x4], 4294967168 }
  0x60   :  { %333 = dma.done.wait [#allocation2 + $0x5], 128 }
  0x61   :  { %334 = vsyncadd [#allocation2 + $0x5], 4294967168 }
  0x62   :  { %335 = dma.done.wait [#allocation2 + $0x6], 128 }
  0x63   :  { %336 = vsyncadd [#allocation2 + $0x6], 4294967168 }
  0x64   :  { %337 = dma.done.wait [#allocation2 + $0x7], 128 }
  0x65   :  { %338 = vsyncadd [#allocation2 + $0x7], 4294967168 }
  0x66   :  { %183 = vsyncmov [#allocation2] }
  0x69   :  { %s184_s1 = vpop.sfrf %183 }
  0x6a   :  { %p283_p0 = scmp.ne.s32.totalorder %s184_s1, 0 }
  0x6c   :  { %188 = shalt.err (%p283_p0)  }
  0x6d   :  { %190 = vsyncmov [#allocation2 + $0x1] }
  0x70   :  { %s191_s2 = vpop.sfrf %190 }
  0x71   :  { %p284_p1 = scmp.ne.s32.totalorder %s191_s2, 0 }
  0x73   :  { %195 = shalt.err (%p284_p1)  }
  0x74   :  { %197 = vsyncmov [#allocation2 + $0x2] }
  0x77   :  { %s198_s23 = vpop.sfrf %197 }
  0x78   :  { %p285_p2 = scmp.ne.s32.totalorder %s198_s23, 0 }
  0x7a   :  { %202 = shalt.err (%p285_p2)  }
  0x7b   :  { %204 = vsyncmov [#allocation2 + $0x3] }
  0x7e   :  { %s205_s24 = vpop.sfrf %204 }
  0x7f   :  { %p286_p3 = scmp.ne.s32.totalorder %s205_s24, 0 }
  0x81   :  { %209 = shalt.err (%p286_p3)  }
  0x82   :  { %211 = vsyncmov [#allocation2 + $0x4] }
  0x85   :  { %s212_s25 = vpop.sfrf %211 }
  0x86   :  { %p287_p4 = scmp.ne.s32.totalorder %s212_s25, 0 }
  0x88   :  { %216 = shalt.err (%p287_p4)  }
  0x89   :  { %218 = vsyncmov [#allocation2 + $0x5] }
  0x8c   :  { %s219_s26 = vpop.sfrf %218 }
  0x8d   :  { %p288_p5 = scmp.ne.s32.totalorder %s219_s26, 0 }
  0x8f   :  { %223 = shalt.err (%p288_p5)  }
  0x90   :  { %225 = vsyncmov [#allocation2 + $0x6] }
  0x93   :  { %s226_s27 = vpop.sfrf %225 }
  0x94   :  { %p289_p6 = scmp.ne.s32.totalorder %s226_s27, 0 }
  0x96   :  { %230 = shalt.err (%p289_p6)  }
  0x97   :  { %232 = vsyncmov [#allocation2 + $0x7] }
  0x9a   :  { %s233_s28 = vpop.sfrf %232 }
  0x9b   :  { %p290_p7 = scmp.ne.s32.totalorder %s233_s28, 0 }
  0x9d   :  { %237 = shalt.err (%p290_p7)  }

</bundles_post_ra>
